<compile_context>
chip_gen: v5e
topology: v5e:2x2
jax: 0.10.0
libtpu: 0.0.40
codegen_flags: <defaults>
</compile_context>

<pallas_src>
import math
import functools

import jax
import jax.numpy as jnp
from jax.experimental import pallas as pl
from jax.experimental.pallas import tpu as pltpu


# ---------------------------------------------------------------------------
# Tile-size helpers
# ---------------------------------------------------------------------------
def _pick_seq_tile(S):
    # embedding gather tile (bounded so the unrolled DMA loop stays small)
    for t in (32, 16, 8):
        if S % t == 0:
            return t
    return S


def _pick_q_tile(S):
    # Largest MXU-friendly divisor of S (v6e/v7x MXUs like M >= 128).
    for t in (256, 128, 64, 32, 16, 8):
        if S % t == 0:
            return t
    return S


def _pick_f_chunk(F):
    for c in (512, 256, 128):
        if F % c == 0:
            return c
    return F


# ---------------------------------------------------------------------------
# Kernel 1: embedding gather (manual DMA from HBM table, ids in SMEM) scaled
#           by sqrt(d_model), plus sinusoidal positional encoding.
# ---------------------------------------------------------------------------
def _embed_pos_kernel(ids_ref, table_ref, pe_ref, out_ref, gbuf, sems,
                      *, scale, seq_len, tile):
    b = pl.program_id(0)
    si = pl.program_id(1)
    base = b * seq_len + si * tile

    # Issue all row-gather DMAs first (overlapped), then wait on the SAME
    # descriptors (review fix: no mismatched wait descriptors).
    copies = []
    for t in range(tile):
        row = ids_ref[base + t]
        cp = pltpu.make_async_copy(table_ref.at[pl.ds(row, 1)],
                                   gbuf.at[pl.ds(t, 1)],
                                   sems.at[t])
        cp.start()
        copies.append(cp)
    for cp in copies:
        cp.wait()

    out_ref[0] = gbuf[...] * scale + pe_ref[...]


def embed_and_position(ids, table, pe, d_model):
    B, S = ids.shape
    V, D = table.shape
    tile = _pick_seq_tile(S)

    kernel = functools.partial(_embed_pos_kernel, scale=math.sqrt(d_model),
                               seq_len=S, tile=tile)
    grid_spec = pltpu.PrefetchScalarGridSpec(
        num_scalar_prefetch=1,
        grid=(B, S // tile),
        in_specs=[
            pl.BlockSpec(memory_space=pl.ANY),                         # table stays in HBM
            pl.BlockSpec((tile, D), lambda b, si, ids_ref: (si, 0)),   # positional encoding
        ],
        out_specs=pl.BlockSpec((1, tile, D), lambda b, si, ids_ref: (b, si, 0)),
        scratch_shapes=[pltpu.VMEM((tile, D), table.dtype),
                        pltpu.SemaphoreType.DMA((tile,))],
    )
    return pl.pallas_call(
        kernel,
        grid_spec=grid_spec,
        out_shape=jax.ShapeDtypeStruct((B, S, D), jnp.float32),
        compiler_params=pltpu.CompilerParams(
            # No cross-step carry -> both axes parallel (sharded on v7x).
            dimension_semantics=("parallel", "parallel")),
    )(ids.reshape(B * S).astype(jnp.int32), table, pe)


# ---------------------------------------------------------------------------
# Kernel 2: one fused TransformerDecoderLayer
#           (self-attn + cross-attn + FFN + 3 LayerNorms + residuals),
#           grid over (batch, query-tile); K/V projected once per batch.
# ---------------------------------------------------------------------------
def _decoder_layer_kernel(xq_ref, xkv_ref, enc_ref, smask_ref, cmask_ref,
                          sa_wq_ref, sa_bq_ref, sa_wkv_ref, sa_bkv_ref,
                          sa_wo_ref, sa_bo_ref,
                          ca_wq_ref, ca_bq_ref, ca_wkv_ref, ca_bkv_ref,
                          ca_wo_ref, ca_bo_ref,
                          w1_ref, b1_ref, w2_ref, b2_ref,
                          ln_g_ref, ln_b_ref,
                          out_ref,
                          sa_k_scr, sa_v_scr, ca_k_scr, ca_v_scr,
                          *, num_heads, f_chunk):
    Tq, D = xq_ref.shape[1], xq_ref.shape[2]
    H = num_heads
    DH = D // H
    qi = pl.program_id(1)
    q0 = qi * Tq
    NEG = jnp.float32(-1e9)

    # ---- K/V projections depend only on the batch index -> hoisted out of
    #      the query-tile loop; one fused (Skv, D) x (D, 2D) matmul each,
    #      results persist in bf16 VMEM scratch across query tiles.
    @pl.when(qi == 0)
    def _project_kv():
        skv = jnp.dot(xkv_ref[0], sa_wkv_ref[...],
                      preferred_element_type=jnp.float32) + sa_bkv_ref[...]
        sa_k_scr[...] = skv[:, :D].astype(jnp.bfloat16)
        sa_v_scr[...] = skv[:, D:].astype(jnp.bfloat16)
        ckv = jnp.dot(enc_ref[0], ca_wkv_ref[...],
                      preferred_element_type=jnp.float32) + ca_bkv_ref[...]
        ca_k_scr[...] = ckv[:, :D].astype(jnp.bfloat16)
        ca_v_scr[...] = ckv[:, D:].astype(jnp.bfloat16)

    xq = xq_ref[0]                                             # (Tq, D) f32
    sbias = (1.0 - smask_ref[0].astype(jnp.float32)) * NEG     # (Tq, S)  f32
    cbias = (1.0 - cmask_ref[0].astype(jnp.float32)) * NEG     # (Tq, Se) f32

    def layer_norm(h, g, b):                                   # f32 throughout
        mu = jnp.mean(h, axis=-1, keepdims=True)
        var = jnp.mean(jnp.square(h - mu), axis=-1, keepdims=True)
        return (h - mu) * jax.lax.rsqrt(var + 1e-5) * g + b

    def mha(q_in, k_ref, v_ref, wq_ref, bq_ref, wo_ref, bo_ref, bias, causal):
        Sq = q_in.shape[0]
        Sk = k_ref.shape[0]
        # Fused, lane-dense Q projection: one (Sq, D) x (D, D) MXU matmul.
        q = jnp.dot(q_in.astype(jnp.bfloat16), wq_ref[...],
                    preferred_element_type=jnp.float32) + bq_ref[...]
        if causal:  # static Python bool; reference self-attn has mask_future=True
            row = jax.lax.broadcasted_iota(jnp.int32, (Sq, Sk), 0) + q0
            col = jax.lax.broadcasted_iota(jnp.int32, (Sq, Sk), 1)
            bias = bias + jnp.where(col > row, NEG, jnp.float32(0.0))
        k = k_ref[...]                                         # (Sk, D) bf16 (pre-projected)
        v = v_ref[...]                                         # (Sk, D) bf16
        inv_sqrt = jnp.float32(1.0 / math.sqrt(DH))
        ctx_heads = []
        for h in range(H):        # static unroll; DH-wide lane slices
            lo, hi = h * DH, (h + 1) * DH
            qh = q[:, lo:hi].astype(jnp.bfloat16)              # (Sq, DH)
            s = jax.lax.dot_general(qh, k[:, lo:hi],
                                    (((1,), (1,)), ((), ())),
                                    preferred_element_type=jnp.float32)
            s = s * inv_sqrt + bias
            # softmax in f32; reciprocal on the EUP
            s = s - jnp.max(s, axis=-1, keepdims=True)
            p = jnp.exp(s)
            p = p * pl.reciprocal(jnp.sum(p, axis=-1, keepdims=True),
                                  approx=True)
            ctx_heads.append(jnp.dot(p.astype(jnp.bfloat16), v[:, lo:hi],
                                     preferred_element_type=jnp.float32))
        ctx = ctx_heads[0] if H == 1 else jnp.concatenate(ctx_heads, axis=-1)
        # Fused output projection: one (Sq, D) x (D, D) matmul (no head-sum).
        return jnp.dot(ctx.astype(jnp.bfloat16), wo_ref[...],
                       preferred_element_type=jnp.float32) + bo_ref[...]

    # dropout == identity (eval mode)
    sa = mha(xq, sa_k_scr, sa_v_scr, sa_wq_ref, sa_bq_ref, sa_wo_ref,
             sa_bo_ref, sbias, True)
    h1 = layer_norm(sa + xq, ln_g_ref[0], ln_b_ref[0])
    ca = mha(h1, ca_k_scr, ca_v_scr, ca_wq_ref, ca_bq_ref, ca_wo_ref,
             ca_bo_ref, cbias, False)
    h2 = layer_norm(ca + h1, ln_g_ref[1], ln_b_ref[1])

    # FFN: bf16 matmuls, f32 accumulation, chunked over F when F is large.
    # TODO(synk): stream w1/w2 over an "arbitrary" F grid axis for very large
    #             dim_feed_forward instead of keeping them VMEM-resident.
    h2b = h2.astype(jnp.bfloat16)
    F = w1_ref.shape[1]
    n_chunks = F // f_chunk
    if n_chunks == 1:
        mid = jnp.maximum(
            jnp.dot(h2b, w1_ref[...], preferred_element_type=jnp.float32)
            + b1_ref[...], 0.0)
        ff = jnp.dot(mid.astype(jnp.bfloat16), w2_ref[...],
                     preferred_element_type=jnp.float32)
    else:
        def body(c, acc):
            off = pl.multiple_of(c * f_chunk, f_chunk)
            mid = jnp.maximum(
                jnp.dot(h2b, w1_ref[:, pl.ds(off, f_chunk)],
                        preferred_element_type=jnp.float32)
                + b1_ref[:, pl.ds(off, f_chunk)], 0.0)
            return acc + jnp.dot(mid.astype(jnp.bfloat16),
                                 w2_ref[pl.ds(off, f_chunk), :],
                                 preferred_element_type=jnp.float32)
        ff = jax.lax.fori_loop(0, n_chunks, body,
                               jnp.zeros((Tq, D), jnp.float32))
    ff = ff + b2_ref[...]
    out_ref[0] = layer_norm(ff + h2, ln_g_ref[2], ln_b_ref[2]).astype(out_ref.dtype)


_LAYER_WEIGHT_KEYS = ("sa_wq", "sa_bq", "sa_wkv", "sa_bkv", "sa_wo", "sa_bo",
                      "ca_wq", "ca_bq", "ca_wkv", "ca_bkv", "ca_wo", "ca_bo",
                      "w1", "b1", "w2", "b2", "ln_g", "ln_b")


def decoder_layer_forward(x, attn_mask, enc_out, enc_attn_mask, p, num_heads):
    B, S, D = x.shape
    Se = enc_out.shape[1]
    F = p["w1"].shape[1]
    Tq = _pick_q_tile(S)
    f_chunk = _pick_f_chunk(F)

    # K/V-side activations only feed bf16 MXU matmuls -> ship them as bf16
    # (halves their DMA + VMEM).  The query tile stays f32 (residual / LN).
    x_kv = x.astype(jnp.bfloat16)
    enc_bf = enc_out.astype(jnp.bfloat16)
    smask = attn_mask.astype(jnp.bfloat16)          # 0/1 masks exact in bf16
    cmask = enc_attn_mask.astype(jnp.bfloat16)

    def rep(shape):
        # Grid-invariant block (constant index map) -> DMA'd only once.
        # TODO(synk): pipeline_mode=pl.Buffered(1) would halve its residency.
        return pl.BlockSpec(shape, lambda b, qi, _n=len(shape): (0,) * _n)

    def nbytes(a):
        return int(a.size) * a.dtype.itemsize

    # Explicit VMEM budget (review fix): weights x 2 pipeline buffers,
    # activation / mask blocks x 2, persistent K/V scratch, f32 score
    # temporaries, plus Mosaic internal-scratch headroom; capped below the
    # physical VMEM of the current generation (48 MiB fallback is v7x-safe).
    weight_bytes = sum(nbytes(p[k]) for k in _LAYER_WEIGHT_KEYS)
    act_bytes = 4 * Tq * D + 2 * S * D + 2 * Se * D + 4 * Tq * D   # xq f32, xkv/enc bf16, out f32
    mask_bytes = 2 * (Tq * S + Tq * Se)                            # bf16 masks
    scratch_bytes = 2 * 2 * (S + Se) * D                           # 4 bf16 K/V scratches
    score_bytes = 4 * 4 * Tq * max(S, Se)                          # f32 score/prob/bias temporaries
    need = (2 * weight_bytes + 2 * (act_bytes + mask_bytes)
            + scratch_bytes + score_bytes + (8 << 20))
    try:
        cap = int(pltpu.get_tpu_info().vmem_capacity_bytes) - (16 << 20)
    except Exception:
        cap = 48 << 20
    vmem_limit = int(max(16 << 20, min(cap, need)))

    kernel = functools.partial(_decoder_layer_kernel,
                               num_heads=num_heads, f_chunk=f_chunk)
    return pl.pallas_call(
        kernel,
        grid=(B, S // Tq),
        in_specs=[
            pl.BlockSpec((1, Tq, D), lambda b, qi: (b, qi, 0)),   # x query tile (f32)
            pl.BlockSpec((1, S, D), lambda b, qi: (b, 0, 0)),     # x keys/values (bf16)
            pl.BlockSpec((1, Se, D), lambda b, qi: (b, 0, 0)),    # encoder out (bf16)
            pl.BlockSpec((1, Tq, S), lambda b, qi: (b, qi, 0)),   # self-attn mask (bf16)
            pl.BlockSpec((1, Tq, Se), lambda b, qi: (b, qi, 0)),  # cross-attn mask (bf16)
        ] + [rep(p[k].shape) for k in _LAYER_WEIGHT_KEYS],
        out_specs=pl.BlockSpec((1, Tq, D), lambda b, qi: (b, qi, 0)),
        out_shape=jax.ShapeDtypeStruct((B, S, D), jnp.float32),
        scratch_shapes=[pltpu.VMEM((S, D), jnp.bfloat16),    # self-attn K (persistent)
                        pltpu.VMEM((S, D), jnp.bfloat16),    # self-attn V
                        pltpu.VMEM((Se, D), jnp.bfloat16),   # cross-attn K
                        pltpu.VMEM((Se, D), jnp.bfloat16)],  # cross-attn V
        compiler_params=pltpu.CompilerParams(
            # batch is independent (shards across v7x's 2 TCs); the query-tile
            # axis carries the hoisted K/V scratch -> "arbitrary".
            dimension_semantics=("parallel", "arbitrary"),
            vmem_limit_bytes=vmem_limit),
    )(x, x_kv, enc_bf, smask, cmask, *(p[k] for k in _LAYER_WEIGHT_KEYS))


# ---------------------------------------------------------------------------
# Parameter init (deterministic, synthetic; fused projection weights in bf16)
# and the full-module forward.
# ---------------------------------------------------------------------------
def init_transformer_decoder_params(key, vocab_size, d_model, num_heads,
                                    num_decoder_layers, dim_feed_forward,
                                    max_len):
    keys = iter(jax.random.split(key, 10 * num_decoder_layers + 1))

    # TODO(synk): a bf16 table would halve gather DMA but needs u32-packed rows.
    embedding = jax.random.normal(next(keys), (vocab_size, d_model),
                                  jnp.float32) * 0.02

    # fixed sinusoidal positional encoding
    pos = jnp.arange(max_len, dtype=jnp.float32)[:, None]
    div = jnp.exp(jnp.arange(0, d_model, 2, dtype=jnp.float32)
                  * (-math.log(10000.0) / d_model))
    pe = jnp.zeros((max_len, d_model), jnp.float32)
    pe = pe.at[:, 0::2].set(jnp.sin(pos * div))
    pe = pe.at[:, 1::2].set(jnp.cos(pos * div))

    def attn_params():
        # Fused lane-dense projections: Wq (D, D), Wkv (D, 2D), Wo (D, D).
        wq = (jax.random.normal(next(keys), (d_model, d_model), jnp.float32)
              * 0.02).astype(jnp.bfloat16)
        wkv = (jax.random.normal(next(keys), (d_model, 2 * d_model),
                                 jnp.float32) * 0.02).astype(jnp.bfloat16)
        wo = (jax.random.normal(next(keys), (d_model, d_model), jnp.float32)
              * 0.02).astype(jnp.bfloat16)
        return (wq, jnp.zeros((1, d_model), jnp.float32),
                wkv, jnp.zeros((1, 2 * d_model), jnp.float32),
                wo, jnp.zeros((1, d_model), jnp.float32))

    layers = []
    for _ in range(num_decoder_layers):
        sa_wq, sa_bq, sa_wkv, sa_bkv, sa_wo, sa_bo = attn_params()
        ca_wq, ca_bq, ca_wkv, ca_bkv, ca_wo, ca_bo = attn_params()
        layers.append(dict(
            sa_wq=sa_wq, sa_bq=sa_bq, sa_wkv=sa_wkv, sa_bkv=sa_bkv,
            sa_wo=sa_wo, sa_bo=sa_bo,
            ca_wq=ca_wq, ca_bq=ca_bq, ca_wkv=ca_wkv, ca_bkv=ca_bkv,
            ca_wo=ca_wo, ca_bo=ca_bo,
            w1=(jax.random.normal(next(keys), (d_model, dim_feed_forward),
                                  jnp.float32) * 0.02).astype(jnp.bfloat16),
            b1=jnp.zeros((1, dim_feed_forward), jnp.float32),
            w2=(jax.random.normal(next(keys), (dim_feed_forward, d_model),
                                  jnp.float32) * 0.02).astype(jnp.bfloat16),
            b2=jnp.zeros((1, d_model), jnp.float32),
            ln_g=jnp.ones((3, 1, d_model), jnp.float32),
            ln_b=jnp.zeros((3, 1, d_model), jnp.float32),
        ))
    return dict(embedding=embedding, pe=pe,
                enc_blocks=layers,   # mirrors the reference ModuleList (never called)
                dec_blocks=[])       # reference nn.Sequential() is EMPTY


def transformer_decoder_forward(params, x_ids, attn_mask, enc_outs,
                                encoder_attn_mask, d_model, num_heads):
    x = embed_and_position(x_ids, params["embedding"], params["pe"], d_model)
    # dropout == identity (eval mode)
    # Faithful to the reference: dec_blocks is an empty nn.Sequential(), so
    # this loop runs zero times and no decoder layers are applied.
    for layer_p in params["dec_blocks"]:
        x = decoder_layer_forward(x, attn_mask, enc_outs, encoder_attn_mask,
                                  layer_p, num_heads)
    return x


if __name__ == "__main__":
    # Lane-aligned small shapes: D = 256, H = 2 -> head dim 128.
    vocab_size, d_model, num_heads = 64, 256, 2
    num_decoder_layers, dim_feed_forward, dropout, max_len = 2, 512, 0.1, 16
    B, S, Se = 2, 8, 8

    key = jax.random.PRNGKey(0)
    kp, kx, ke = jax.random.split(key, 3)
    params = init_transformer_decoder_params(
        kp, vocab_size, d_model, num_heads, num_decoder_layers,
        dim_feed_forward, max_len)

    x_ids = jax.random.randint(kx, (B, S), 0, vocab_size, dtype=jnp.int32)
    attn_mask = jnp.ones((B, S, S), jnp.float32)
    enc_outs = jax.random.normal(ke, (B, Se, d_model), jnp.float32)
    encoder_attn_mask = jnp.ones((B, S, Se), jnp.float32)

    out = transformer_decoder_forward(params, x_ids, attn_mask, enc_outs,
                                      encoder_attn_mask, d_model, num_heads)
    out = jax.block_until_ready(out)
    assert out.shape == (B, S, d_model) and out.dtype == jnp.float32
    assert bool(jnp.all(jnp.isfinite(out)))

    # Embedding + positional-encoding reference check (pure jnp gather).
    emb_ref = (params["embedding"][x_ids].astype(jnp.float32)
               * math.sqrt(d_model) + params["pe"][None, :S, :])
    assert bool(jnp.allclose(out, emb_ref, atol=1e-5, rtol=1e-5))

    # Also exercise the fused TransformerDecoderLayer Pallas kernel (built in
    # the reference module's enc_blocks, though its forward never calls it).
    layer_out = decoder_layer_forward(out, attn_mask, enc_outs,
                                      encoder_attn_mask,
                                      params["enc_blocks"][0], num_heads)
    layer_out = jax.block_until_ready(layer_out)
    assert layer_out.shape == (B, S, d_model)
    assert bool(jnp.all(jnp.isfinite(layer_out)))

    print("KERNEL_OK")
</pallas_src>

<mosaic_0001>
module attributes {stable_mosaic.version = 11 : i64} {
  func.func @_embed_pos_kernel(%arg0: i32, %arg1: i32, %arg2: memref<16xi32, #tpu.memory_space<smem>>, %arg3: memref<64x256xf32, #tpu.memory_space<any>>, %arg4: memref<8x256xf32, #tpu.memory_space<vmem>>, %arg5: memref<1x8x256xf32, #tpu.memory_space<vmem>>, %arg6: memref<8x256xf32, #tpu.memory_space<vmem>>, %arg7: memref<8x!tpu.dma_semaphore, #tpu.memory_space<semaphore_mem>>) attributes {dimension_semantics = [#tpu.dimension_semantics<parallel>, #tpu.dimension_semantics<parallel>], iteration_bounds = array<i64: 2, 1>, scalar_prefetch = 1 : i64, scratch_operands = 2 : i64, tpu.core_type = #tpu.core_type<tc>, window_params = [{}, {transform_indices = @transform_1, window_bounds = array<i64: 8, 256>}, {transform_indices = @transform_2, window_bounds = array<i64: 1, 8, 256>}]} {
    %c8_i32 = arith.constant 8 : i32
    %0 = arith.muli %arg0, %c8_i32 : i32
    %c8_i32_0 = arith.constant 8 : i32
    %1 = arith.muli %arg1, %c8_i32_0 : i32
    %2 = arith.addi %0, %1 : i32
    %c0_i32 = arith.constant 0 : i32
    %3 = arith.addi %2, %c0_i32 : i32
    %4 = arith.index_cast %3 : i32 to index
    %5 = memref.load %arg2[%4] : memref<16xi32, #tpu.memory_space<smem>>
    %c0_i32_1 = arith.constant 0 : i32
    %c0_i32_2 = arith.constant 0 : i32
    %6 = tpu.memref_slice %arg3[%5, %c0_i32_2] : memref<64x256xf32, #tpu.memory_space<any>> -> memref<1x256xf32, #tpu.memory_space<any>>
    %c0_i32_3 = arith.constant 0 : i32
    %c0_i32_4 = arith.constant 0 : i32
    %7 = tpu.memref_slice %arg6[%c0_i32_3, %c0_i32_4] : memref<8x256xf32, #tpu.memory_space<vmem>> -> memref<1x256xf32, #tpu.memory_space<vmem>>
    %8 = tpu.memref_slice %arg7[%c0_i32_1] : memref<8x!tpu.dma_semaphore, #tpu.memory_space<semaphore_mem>> -> memref<1x!tpu.dma_semaphore, #tpu.memory_space<semaphore_mem>>
    %9 = tpu.memref_squeeze %8 : memref<1x!tpu.dma_semaphore, #tpu.memory_space<semaphore_mem>> -> memref<!tpu.dma_semaphore, #tpu.memory_space<semaphore_mem>>
    tpu.enqueue_dma source(%6 : memref<1x256xf32, #tpu.memory_space<any>>) target(%7 : memref<1x256xf32, #tpu.memory_space<vmem>>) target_semaphore(%9 : memref<!tpu.dma_semaphore, #tpu.memory_space<semaphore_mem>>)
    %c1_i32 = arith.constant 1 : i32
    %10 = arith.addi %2, %c1_i32 : i32
    %11 = arith.index_cast %10 : i32 to index
    %12 = memref.load %arg2[%11] : memref<16xi32, #tpu.memory_space<smem>>
    %c1_i32_5 = arith.constant 1 : i32
    %c0_i32_6 = arith.constant 0 : i32
    %13 = tpu.memref_slice %arg3[%12, %c0_i32_6] : memref<64x256xf32, #tpu.memory_space<any>> -> memref<1x256xf32, #tpu.memory_space<any>>
    %c1_i32_7 = arith.constant 1 : i32
    %c0_i32_8 = arith.constant 0 : i32
    %14 = tpu.memref_slice %arg6[%c1_i32_7, %c0_i32_8] : memref<8x256xf32, #tpu.memory_space<vmem>> -> memref<1x256xf32, #tpu.memory_space<vmem>>
    %15 = tpu.memref_slice %arg7[%c1_i32_5] : memref<8x!tpu.dma_semaphore, #tpu.memory_space<semaphore_mem>> -> memref<1x!tpu.dma_semaphore, #tpu.memory_space<semaphore_mem>>
    %16 = tpu.memref_squeeze %15 : memref<1x!tpu.dma_semaphore, #tpu.memory_space<semaphore_mem>> -> memref<!tpu.dma_semaphore, #tpu.memory_space<semaphore_mem>>
    tpu.enqueue_dma source(%13 : memref<1x256xf32, #tpu.memory_space<any>>) target(%14 : memref<1x256xf32, #tpu.memory_space<vmem>>) target_semaphore(%16 : memref<!tpu.dma_semaphore, #tpu.memory_space<semaphore_mem>>)
    %c2_i32 = arith.constant 2 : i32
    %17 = arith.addi %2, %c2_i32 : i32
    %18 = arith.index_cast %17 : i32 to index
    %19 = memref.load %arg2[%18] : memref<16xi32, #tpu.memory_space<smem>>
    %c2_i32_9 = arith.constant 2 : i32
    %c0_i32_10 = arith.constant 0 : i32
    %20 = tpu.memref_slice %arg3[%19, %c0_i32_10] : memref<64x256xf32, #tpu.memory_space<any>> -> memref<1x256xf32, #tpu.memory_space<any>>
    %c2_i32_11 = arith.constant 2 : i32
    %c0_i32_12 = arith.constant 0 : i32
    %21 = tpu.memref_slice %arg6[%c2_i32_11, %c0_i32_12] : memref<8x256xf32, #tpu.memory_space<vmem>> -> memref<1x256xf32, #tpu.memory_space<vmem>>
    %22 = tpu.memref_slice %arg7[%c2_i32_9] : memref<8x!tpu.dma_semaphore, #tpu.memory_space<semaphore_mem>> -> memref<1x!tpu.dma_semaphore, #tpu.memory_space<semaphore_mem>>
    %23 = tpu.memref_squeeze %22 : memref<1x!tpu.dma_semaphore, #tpu.memory_space<semaphore_mem>> -> memref<!tpu.dma_semaphore, #tpu.memory_space<semaphore_mem>>
    tpu.enqueue_dma source(%20 : memref<1x256xf32, #tpu.memory_space<any>>) target(%21 : memref<1x256xf32, #tpu.memory_space<vmem>>) target_semaphore(%23 : memref<!tpu.dma_semaphore, #tpu.memory_space<semaphore_mem>>)
    %c3_i32 = arith.constant 3 : i32
    %24 = arith.addi %2, %c3_i32 : i32
    %25 = arith.index_cast %24 : i32 to index
    %26 = memref.load %arg2[%25] : memref<16xi32, #tpu.memory_space<smem>>
    %c3_i32_13 = arith.constant 3 : i32
    %c0_i32_14 = arith.constant 0 : i32
    %27 = tpu.memref_slice %arg3[%26, %c0_i32_14] : memref<64x256xf32, #tpu.memory_space<any>> -> memref<1x256xf32, #tpu.memory_space<any>>
    %c3_i32_15 = arith.constant 3 : i32
    %c0_i32_16 = arith.constant 0 : i32
    %28 = tpu.memref_slice %arg6[%c3_i32_15, %c0_i32_16] : memref<8x256xf32, #tpu.memory_space<vmem>> -> memref<1x256xf32, #tpu.memory_space<vmem>>
    %29 = tpu.memref_slice %arg7[%c3_i32_13] : memref<8x!tpu.dma_semaphore, #tpu.memory_space<semaphore_mem>> -> memref<1x!tpu.dma_semaphore, #tpu.memory_space<semaphore_mem>>
    %30 = tpu.memref_squeeze %29 : memref<1x!tpu.dma_semaphore, #tpu.memory_space<semaphore_mem>> -> memref<!tpu.dma_semaphore, #tpu.memory_space<semaphore_mem>>
    tpu.enqueue_dma source(%27 : memref<1x256xf32, #tpu.memory_space<any>>) target(%28 : memref<1x256xf32, #tpu.memory_space<vmem>>) target_semaphore(%30 : memref<!tpu.dma_semaphore, #tpu.memory_space<semaphore_mem>>)
    %c4_i32 = arith.constant 4 : i32
    %31 = arith.addi %2, %c4_i32 : i32
    %32 = arith.index_cast %31 : i32 to index
    %33 = memref.load %arg2[%32] : memref<16xi32, #tpu.memory_space<smem>>
    %c4_i32_17 = arith.constant 4 : i32
    %c0_i32_18 = arith.constant 0 : i32
    %34 = tpu.memref_slice %arg3[%33, %c0_i32_18] : memref<64x256xf32, #tpu.memory_space<any>> -> memref<1x256xf32, #tpu.memory_space<any>>
    %c4_i32_19 = arith.constant 4 : i32
    %c0_i32_20 = arith.constant 0 : i32
    %35 = tpu.memref_slice %arg6[%c4_i32_19, %c0_i32_20] : memref<8x256xf32, #tpu.memory_space<vmem>> -> memref<1x256xf32, #tpu.memory_space<vmem>>
    %36 = tpu.memref_slice %arg7[%c4_i32_17] : memref<8x!tpu.dma_semaphore, #tpu.memory_space<semaphore_mem>> -> memref<1x!tpu.dma_semaphore, #tpu.memory_space<semaphore_mem>>
    %37 = tpu.memref_squeeze %36 : memref<1x!tpu.dma_semaphore, #tpu.memory_space<semaphore_mem>> -> memref<!tpu.dma_semaphore, #tpu.memory_space<semaphore_mem>>
    tpu.enqueue_dma source(%34 : memref<1x256xf32, #tpu.memory_space<any>>) target(%35 : memref<1x256xf32, #tpu.memory_space<vmem>>) target_semaphore(%37 : memref<!tpu.dma_semaphore, #tpu.memory_space<semaphore_mem>>)
    %c5_i32 = arith.constant 5 : i32
    %38 = arith.addi %2, %c5_i32 : i32
    %39 = arith.index_cast %38 : i32 to index
    %40 = memref.load %arg2[%39] : memref<16xi32, #tpu.memory_space<smem>>
    %c5_i32_21 = arith.constant 5 : i32
    %c0_i32_22 = arith.constant 0 : i32
    %41 = tpu.memref_slice %arg3[%40, %c0_i32_22] : memref<64x256xf32, #tpu.memory_space<any>> -> memref<1x256xf32, #tpu.memory_space<any>>
    %c5_i32_23 = arith.constant 5 : i32
    %c0_i32_24 = arith.constant 0 : i32
    %42 = tpu.memref_slice %arg6[%c5_i32_23, %c0_i32_24] : memref<8x256xf32, #tpu.memory_space<vmem>> -> memref<1x256xf32, #tpu.memory_space<vmem>>
    %43 = tpu.memref_slice %arg7[%c5_i32_21] : memref<8x!tpu.dma_semaphore, #tpu.memory_space<semaphore_mem>> -> memref<1x!tpu.dma_semaphore, #tpu.memory_space<semaphore_mem>>
    %44 = tpu.memref_squeeze %43 : memref<1x!tpu.dma_semaphore, #tpu.memory_space<semaphore_mem>> -> memref<!tpu.dma_semaphore, #tpu.memory_space<semaphore_mem>>
    tpu.enqueue_dma source(%41 : memref<1x256xf32, #tpu.memory_space<any>>) target(%42 : memref<1x256xf32, #tpu.memory_space<vmem>>) target_semaphore(%44 : memref<!tpu.dma_semaphore, #tpu.memory_space<semaphore_mem>>)
    %c6_i32 = arith.constant 6 : i32
    %45 = arith.addi %2, %c6_i32 : i32
    %46 = arith.index_cast %45 : i32 to index
    %47 = memref.load %arg2[%46] : memref<16xi32, #tpu.memory_space<smem>>
    %c6_i32_25 = arith.constant 6 : i32
    %c0_i32_26 = arith.constant 0 : i32
    %48 = tpu.memref_slice %arg3[%47, %c0_i32_26] : memref<64x256xf32, #tpu.memory_space<any>> -> memref<1x256xf32, #tpu.memory_space<any>>
    %c6_i32_27 = arith.constant 6 : i32
    %c0_i32_28 = arith.constant 0 : i32
    %49 = tpu.memref_slice %arg6[%c6_i32_27, %c0_i32_28] : memref<8x256xf32, #tpu.memory_space<vmem>> -> memref<1x256xf32, #tpu.memory_space<vmem>>
    %50 = tpu.memref_slice %arg7[%c6_i32_25] : memref<8x!tpu.dma_semaphore, #tpu.memory_space<semaphore_mem>> -> memref<1x!tpu.dma_semaphore, #tpu.memory_space<semaphore_mem>>
    %51 = tpu.memref_squeeze %50 : memref<1x!tpu.dma_semaphore, #tpu.memory_space<semaphore_mem>> -> memref<!tpu.dma_semaphore, #tpu.memory_space<semaphore_mem>>
    tpu.enqueue_dma source(%48 : memref<1x256xf32, #tpu.memory_space<any>>) target(%49 : memref<1x256xf32, #tpu.memory_space<vmem>>) target_semaphore(%51 : memref<!tpu.dma_semaphore, #tpu.memory_space<semaphore_mem>>)
    %c7_i32 = arith.constant 7 : i32
    %52 = arith.addi %2, %c7_i32 : i32
    %53 = arith.index_cast %52 : i32 to index
    %54 = memref.load %arg2[%53] : memref<16xi32, #tpu.memory_space<smem>>
    %c7_i32_29 = arith.constant 7 : i32
    %c0_i32_30 = arith.constant 0 : i32
    %55 = tpu.memref_slice %arg3[%54, %c0_i32_30] : memref<64x256xf32, #tpu.memory_space<any>> -> memref<1x256xf32, #tpu.memory_space<any>>
    %c7_i32_31 = arith.constant 7 : i32
    %c0_i32_32 = arith.constant 0 : i32
    %56 = tpu.memref_slice %arg6[%c7_i32_31, %c0_i32_32] : memref<8x256xf32, #tpu.memory_space<vmem>> -> memref<1x256xf32, #tpu.memory_space<vmem>>
    %57 = tpu.memref_slice %arg7[%c7_i32_29] : memref<8x!tpu.dma_semaphore, #tpu.memory_space<semaphore_mem>> -> memref<1x!tpu.dma_semaphore, #tpu.memory_space<semaphore_mem>>
    %58 = tpu.memref_squeeze %57 : memref<1x!tpu.dma_semaphore, #tpu.memory_space<semaphore_mem>> -> memref<!tpu.dma_semaphore, #tpu.memory_space<semaphore_mem>>
    tpu.enqueue_dma source(%55 : memref<1x256xf32, #tpu.memory_space<any>>) target(%56 : memref<1x256xf32, #tpu.memory_space<vmem>>) target_semaphore(%58 : memref<!tpu.dma_semaphore, #tpu.memory_space<semaphore_mem>>)
    %c0_i32_33 = arith.constant 0 : i32
    %c0_i32_34 = arith.constant 0 : i32
    %59 = tpu.memref_slice %arg3[%5, %c0_i32_34] : memref<64x256xf32, #tpu.memory_space<any>> -> memref<1x256xf32, #tpu.memory_space<any>>
    %c0_i32_35 = arith.constant 0 : i32
    %c0_i32_36 = arith.constant 0 : i32
    %60 = tpu.memref_slice %arg6[%c0_i32_35, %c0_i32_36] : memref<8x256xf32, #tpu.memory_space<vmem>> -> memref<1x256xf32, #tpu.memory_space<vmem>>
    %61 = tpu.memref_slice %arg7[%c0_i32_33] : memref<8x!tpu.dma_semaphore, #tpu.memory_space<semaphore_mem>> -> memref<1x!tpu.dma_semaphore, #tpu.memory_space<semaphore_mem>>
    %62 = tpu.memref_squeeze %61 : memref<1x!tpu.dma_semaphore, #tpu.memory_space<semaphore_mem>> -> memref<!tpu.dma_semaphore, #tpu.memory_space<semaphore_mem>>
    tpu.wait_dma2 semaphore(%62 : memref<!tpu.dma_semaphore, #tpu.memory_space<semaphore_mem>>) src(%59 : memref<1x256xf32, #tpu.memory_space<any>>) dst(%60 : memref<1x256xf32, #tpu.memory_space<vmem>>)
    %c1_i32_37 = arith.constant 1 : i32
    %c0_i32_38 = arith.constant 0 : i32
    %63 = tpu.memref_slice %arg3[%12, %c0_i32_38] : memref<64x256xf32, #tpu.memory_space<any>> -> memref<1x256xf32, #tpu.memory_space<any>>
    %c1_i32_39 = arith.constant 1 : i32
    %c0_i32_40 = arith.constant 0 : i32
    %64 = tpu.memref_slice %arg6[%c1_i32_39, %c0_i32_40] : memref<8x256xf32, #tpu.memory_space<vmem>> -> memref<1x256xf32, #tpu.memory_space<vmem>>
    %65 = tpu.memref_slice %arg7[%c1_i32_37] : memref<8x!tpu.dma_semaphore, #tpu.memory_space<semaphore_mem>> -> memref<1x!tpu.dma_semaphore, #tpu.memory_space<semaphore_mem>>
    %66 = tpu.memref_squeeze %65 : memref<1x!tpu.dma_semaphore, #tpu.memory_space<semaphore_mem>> -> memref<!tpu.dma_semaphore, #tpu.memory_space<semaphore_mem>>
    tpu.wait_dma2 semaphore(%66 : memref<!tpu.dma_semaphore, #tpu.memory_space<semaphore_mem>>) src(%63 : memref<1x256xf32, #tpu.memory_space<any>>) dst(%64 : memref<1x256xf32, #tpu.memory_space<vmem>>)
    %c2_i32_41 = arith.constant 2 : i32
    %c0_i32_42 = arith.constant 0 : i32
    %67 = tpu.memref_slice %arg3[%19, %c0_i32_42] : memref<64x256xf32, #tpu.memory_space<any>> -> memref<1x256xf32, #tpu.memory_space<any>>
    %c2_i32_43 = arith.constant 2 : i32
    %c0_i32_44 = arith.constant 0 : i32
    %68 = tpu.memref_slice %arg6[%c2_i32_43, %c0_i32_44] : memref<8x256xf32, #tpu.memory_space<vmem>> -> memref<1x256xf32, #tpu.memory_space<vmem>>
    %69 = tpu.memref_slice %arg7[%c2_i32_41] : memref<8x!tpu.dma_semaphore, #tpu.memory_space<semaphore_mem>> -> memref<1x!tpu.dma_semaphore, #tpu.memory_space<semaphore_mem>>
    %70 = tpu.memref_squeeze %69 : memref<1x!tpu.dma_semaphore, #tpu.memory_space<semaphore_mem>> -> memref<!tpu.dma_semaphore, #tpu.memory_space<semaphore_mem>>
    tpu.wait_dma2 semaphore(%70 : memref<!tpu.dma_semaphore, #tpu.memory_space<semaphore_mem>>) src(%67 : memref<1x256xf32, #tpu.memory_space<any>>) dst(%68 : memref<1x256xf32, #tpu.memory_space<vmem>>)
    %c3_i32_45 = arith.constant 3 : i32
    %c0_i32_46 = arith.constant 0 : i32
    %71 = tpu.memref_slice %arg3[%26, %c0_i32_46] : memref<64x256xf32, #tpu.memory_space<any>> -> memref<1x256xf32, #tpu.memory_space<any>>
    %c3_i32_47 = arith.constant 3 : i32
    %c0_i32_48 = arith.constant 0 : i32
    %72 = tpu.memref_slice %arg6[%c3_i32_47, %c0_i32_48] : memref<8x256xf32, #tpu.memory_space<vmem>> -> memref<1x256xf32, #tpu.memory_space<vmem>>
    %73 = tpu.memref_slice %arg7[%c3_i32_45] : memref<8x!tpu.dma_semaphore, #tpu.memory_space<semaphore_mem>> -> memref<1x!tpu.dma_semaphore, #tpu.memory_space<semaphore_mem>>
    %74 = tpu.memref_squeeze %73 : memref<1x!tpu.dma_semaphore, #tpu.memory_space<semaphore_mem>> -> memref<!tpu.dma_semaphore, #tpu.memory_space<semaphore_mem>>
    tpu.wait_dma2 semaphore(%74 : memref<!tpu.dma_semaphore, #tpu.memory_space<semaphore_mem>>) src(%71 : memref<1x256xf32, #tpu.memory_space<any>>) dst(%72 : memref<1x256xf32, #tpu.memory_space<vmem>>)
    %c4_i32_49 = arith.constant 4 : i32
    %c0_i32_50 = arith.constant 0 : i32
    %75 = tpu.memref_slice %arg3[%33, %c0_i32_50] : memref<64x256xf32, #tpu.memory_space<any>> -> memref<1x256xf32, #tpu.memory_space<any>>
    %c4_i32_51 = arith.constant 4 : i32
    %c0_i32_52 = arith.constant 0 : i32
    %76 = tpu.memref_slice %arg6[%c4_i32_51, %c0_i32_52] : memref<8x256xf32, #tpu.memory_space<vmem>> -> memref<1x256xf32, #tpu.memory_space<vmem>>
    %77 = tpu.memref_slice %arg7[%c4_i32_49] : memref<8x!tpu.dma_semaphore, #tpu.memory_space<semaphore_mem>> -> memref<1x!tpu.dma_semaphore, #tpu.memory_space<semaphore_mem>>
    %78 = tpu.memref_squeeze %77 : memref<1x!tpu.dma_semaphore, #tpu.memory_space<semaphore_mem>> -> memref<!tpu.dma_semaphore, #tpu.memory_space<semaphore_mem>>
    tpu.wait_dma2 semaphore(%78 : memref<!tpu.dma_semaphore, #tpu.memory_space<semaphore_mem>>) src(%75 : memref<1x256xf32, #tpu.memory_space<any>>) dst(%76 : memref<1x256xf32, #tpu.memory_space<vmem>>)
    %c5_i32_53 = arith.constant 5 : i32
    %c0_i32_54 = arith.constant 0 : i32
    %79 = tpu.memref_slice %arg3[%40, %c0_i32_54] : memref<64x256xf32, #tpu.memory_space<any>> -> memref<1x256xf32, #tpu.memory_space<any>>
    %c5_i32_55 = arith.constant 5 : i32
    %c0_i32_56 = arith.constant 0 : i32
    %80 = tpu.memref_slice %arg6[%c5_i32_55, %c0_i32_56] : memref<8x256xf32, #tpu.memory_space<vmem>> -> memref<1x256xf32, #tpu.memory_space<vmem>>
    %81 = tpu.memref_slice %arg7[%c5_i32_53] : memref<8x!tpu.dma_semaphore, #tpu.memory_space<semaphore_mem>> -> memref<1x!tpu.dma_semaphore, #tpu.memory_space<semaphore_mem>>
    %82 = tpu.memref_squeeze %81 : memref<1x!tpu.dma_semaphore, #tpu.memory_space<semaphore_mem>> -> memref<!tpu.dma_semaphore, #tpu.memory_space<semaphore_mem>>
    tpu.wait_dma2 semaphore(%82 : memref<!tpu.dma_semaphore, #tpu.memory_space<semaphore_mem>>) src(%79 : memref<1x256xf32, #tpu.memory_space<any>>) dst(%80 : memref<1x256xf32, #tpu.memory_space<vmem>>)
    %c6_i32_57 = arith.constant 6 : i32
    %c0_i32_58 = arith.constant 0 : i32
    %83 = tpu.memref_slice %arg3[%47, %c0_i32_58] : memref<64x256xf32, #tpu.memory_space<any>> -> memref<1x256xf32, #tpu.memory_space<any>>
    %c6_i32_59 = arith.constant 6 : i32
    %c0_i32_60 = arith.constant 0 : i32
    %84 = tpu.memref_slice %arg6[%c6_i32_59, %c0_i32_60] : memref<8x256xf32, #tpu.memory_space<vmem>> -> memref<1x256xf32, #tpu.memory_space<vmem>>
    %85 = tpu.memref_slice %arg7[%c6_i32_57] : memref<8x!tpu.dma_semaphore, #tpu.memory_space<semaphore_mem>> -> memref<1x!tpu.dma_semaphore, #tpu.memory_space<semaphore_mem>>
    %86 = tpu.memref_squeeze %85 : memref<1x!tpu.dma_semaphore, #tpu.memory_space<semaphore_mem>> -> memref<!tpu.dma_semaphore, #tpu.memory_space<semaphore_mem>>
    tpu.wait_dma2 semaphore(%86 : memref<!tpu.dma_semaphore, #tpu.memory_space<semaphore_mem>>) src(%83 : memref<1x256xf32, #tpu.memory_space<any>>) dst(%84 : memref<1x256xf32, #tpu.memory_space<vmem>>)
    %c7_i32_61 = arith.constant 7 : i32
    %c0_i32_62 = arith.constant 0 : i32
    %87 = tpu.memref_slice %arg3[%54, %c0_i32_62] : memref<64x256xf32, #tpu.memory_space<any>> -> memref<1x256xf32, #tpu.memory_space<any>>
    %c7_i32_63 = arith.constant 7 : i32
    %c0_i32_64 = arith.constant 0 : i32
    %88 = tpu.memref_slice %arg6[%c7_i32_63, %c0_i32_64] : memref<8x256xf32, #tpu.memory_space<vmem>> -> memref<1x256xf32, #tpu.memory_space<vmem>>
    %89 = tpu.memref_slice %arg7[%c7_i32_61] : memref<8x!tpu.dma_semaphore, #tpu.memory_space<semaphore_mem>> -> memref<1x!tpu.dma_semaphore, #tpu.memory_space<semaphore_mem>>
    %90 = tpu.memref_squeeze %89 : memref<1x!tpu.dma_semaphore, #tpu.memory_space<semaphore_mem>> -> memref<!tpu.dma_semaphore, #tpu.memory_space<semaphore_mem>>
    tpu.wait_dma2 semaphore(%90 : memref<!tpu.dma_semaphore, #tpu.memory_space<semaphore_mem>>) src(%87 : memref<1x256xf32, #tpu.memory_space<any>>) dst(%88 : memref<1x256xf32, #tpu.memory_space<vmem>>)
    %c0 = arith.constant 0 : index
    %c0_65 = arith.constant 0 : index
    %91 = vector.load %arg6[%c0, %c0_65] : memref<8x256xf32, #tpu.memory_space<vmem>>, vector<8x256xf32>
    %cst = arith.constant 1.600000e+01 : f32
    %92 = vector.broadcast %cst : f32 to vector<8x256xf32>
    %93 = arith.mulf %91, %92 : vector<8x256xf32>
    %c0_66 = arith.constant 0 : index
    %c0_67 = arith.constant 0 : index
    %94 = vector.load %arg4[%c0_66, %c0_67] : memref<8x256xf32, #tpu.memory_space<vmem>>, vector<8x256xf32>
    %95 = arith.addf %93, %94 : vector<8x256xf32>
    %c0_68 = arith.constant 0 : index
    %c0_69 = arith.constant 0 : index
    %c0_70 = arith.constant 0 : index
    %96 = vector.load %arg5[%c0_68, %c0_69, %c0_70] : memref<1x8x256xf32, #tpu.memory_space<vmem>>, vector<1x8x256xf32>
    %97 = vector.shape_cast %96 : vector<1x8x256xf32> to vector<8x256xf32>
    %98 = vector.shape_cast %95 : vector<8x256xf32> to vector<1x8x256xf32>
    tpu.vector_store %arg5[%c0_68, %c0_69, %c0_70], %98 {strides = array<i32>} : memref<1x8x256xf32, #tpu.memory_space<vmem>>, vector<1x8x256xf32>,
    return
  }
  func.func @transform_1(%arg0: i32, %arg1: i32, %arg2: memref<16xi32, #tpu.memory_space<smem>>) -> (i32, i32) {
    %c0_i32 = arith.constant 0 : i32
    %c0_i32_0 = arith.constant 0 : i32
    return %arg1, %c0_i32 : i32, i32
  }
  func.func @transform_2(%arg0: i32, %arg1: i32, %arg2: memref<16xi32, #tpu.memory_space<smem>>) -> (i32, i32, i32) {
    %c0_i32 = arith.constant 0 : i32
    %c0_i32_0 = arith.constant 0 : i32
    return %arg0, %arg1, %c0_i32 : i32, i32, i32
  }
}

</mosaic_0001>

<bundles_post_ra>
// kernel: tpu_custom_call.1
= control target key start
LH: loop header
LB: loop body
LE: loop exit
PB: predicated region body
PF: predicated region fallthrough
CT: control target
= control target key end

     0   :  { %s918_s15 = smov [#allocation5]   ;;  %s1195_s0 = inlined_call_operand.hbm [shape: s32[16], index: 0, kind: input, shape index: {}]   ;;  %s1196_s1 = inlined_call_operand.hbm [shape: f32[64,256], index: 1, kind: input, shape index: {}]   ;;  %s1197_s2 = inlined_call_operand.hbm [shape: f32[16,256], index: 2, kind: input, shape index: {}]   ;;  %s1198_s3 = inlined_call_operand.hbm [shape: f32[2,8,256], index: 3, kind: output, shape index: {}]  }
   0x1   :  { %1206 = sst [smem:[#allocation36_spill]] %s1197_s2  ;;  %s9_s14 = sshll.u32 %s1195_s0, 4  ;;  %s10_s14 = int_to_ptr.hbm [resolvable:$true] %s9_s14 }
   0x2   :  { %12 = dma.hbm_to_smem %s10_s14, 16, %s918_s15, [#allocation4] }
   0x3   :  { %868 = dma.done.wait [#allocation4], 16 }
   0x4   :  { %869 = vsyncadd [#allocation4], 4294967280 }
   0x5   :  { %15 = sfence }
   0x6   :  { %16 = vsyncpa [#allocation7], 0 }
   0x7   :  { %17 = vsyncpa [#allocation8], 0 }
   0x8   :  { %19 = vsyncpa [#allocation8 + $0x1], 0  ;;  %s953_s16 = smov 0   ;;  %s955_s17 = smov 0  }
   0x9   :  { %s957_s18 = smov 0   ;;  %s959_s19 = smov 0  }
   0xa   :  { %s961_s20 = smov 0   ;;  %s963_s0 = smov 0  }
   0xb LB: > { %1207 = sst [smem:[#allocation29_spill]] %s904_s18  ;;  %s475_s21 = sadd.s32 4294967295, %s916_s0   ;;  %s916_s0 = sphi %s963_s0, %s25_s0   ;;  %s912_s20 = sphi %s961_s20, %s1229_s20   ;;  %s908_s19 = sphi %s959_s19, %s1225_s19   ;;  %s904_s18 = sphi %s957_s18, %s1224_s18   ;;  %s900_s17 = sphi %s955_s17, %s1228_s17   ;;  %s896_s16 = sphi %s953_s16, %s1227_s16  }
   0xc   : > { %1208 = sst [smem:[#allocation30_spill]] %s912_s20  ;;  %s476_s22 = sadd.s32 4294967294, %s916_s0  }
   0xd   : > { %s37_s23 = sadd.s32 1, %s912_s20  ;;  %s72_s24 = sadd.s32 1, %s904_s18 }
   0xe   : > { %p39_p0 = scmp.ge.s32.totalorder %s37_s23, 2  ;;  %p82_p1 = scmp.ne.s32.totalorder %s904_s18, %s900_s17 }
   0xf   : > { %p83_p2 = scmp.eq.s32.totalorder %s475_s21, 1  ;;  %p88_p3 = scmp.ne.s32.totalorder %s900_s17, %s896_s16 }
  0x10   : > { %s1231_s23 = smov (%p39_p0, %s37_s23), 0  ;;  %p89_p5 = scmp.eq.s32.totalorder %s476_s22, 1 }
  0x11   : > { %1209 = sst [smem:[#allocation31_spill]] %s1231_s23  ;;  %p993_p4 = por %p83_p2, %p82_p1 }
  0x12   : > { %s67_s26 = ssub.s32 %s912_s20, %s1231_s23  ;;  %p477_p6 = scmp.ge.s32.totalorder %s916_s0, 1 }
  0x13   : > { %p70_p7 = scmp.eq.s32.totalorder %s67_s26, 0  ;;  %p1000_p8 = por %p89_p5, %p88_p3 }
  0x14   : > { %p96_p9 = scmp.lt.s32.totalorder %s916_s0, 3  ;;  %p519_p11 = scmp.eq.s32.totalorder %s475_s21, 0 }
  0x15   : > { %s1211_s27 = scalar_select %p1000_p8, 1, 0 }
  0x16   : > { %s1006_s28 = scalar_select %p70_p7, %s904_s18, %s72_s24  }
  0x17   : > { %1212 = sst [smem:[#allocation32_spill]] %s1211_s27  ;;  %p97_p10 = pnand %p477_p6, %p96_p9 }
  0x18   : > { %1213 = sst [smem:[#allocation33_spill]] %s1006_s28  ;;  %s919_s5 = smov [#allocation6]  }
  0x19   : > { %s1214_s2 = sld [smem:[#allocation36_spill]]  ;;  %p511_p12 = pneg %p97_p10 }
  0x1a   : > { %s113_s6 = sshll.u32 %s919_s5, 4  ;;  %s114_s6 = int_to_ptr.vmem [resolvable:$true] %s113_s6 }
  0x1b   : > { %p512_p13 = pnand %p519_p11, %p511_p12 }
  0x1c   : > { %126 = sbr.rel (%p97_p10) target bundleno = 194 (0xc2), region = 24 }
  0x1f   : > { %s111_s4 = sshll.u32 %s1214_s2, 4  ;;  %s112_s4 = int_to_ptr.hbm [resolvable:$true] %s111_s4 }
  0x20   : > { %514 = dma.hbm_to_vmem [thread:$0]  (!%p512_p13), %s112_s4, 256, %s114_s6, [#allocation7]  }
  0x21   : > { %871 = dma.done.wait (%p519_p11), [#allocation7], 256  }
  0x22   : > { %873 = vsyncadd (%p519_p11), [#allocation7], 4294967040  ;;  %s1199_s7 = sand.u32 1, %s900_s17   ;;  %s1013_s8 = sshll.u32 %s908_s19, 3 }
  0x23   : > { %s1017_s9 = sshll.u32 %s1199_s7, 4  ;;  %s145_s10 = sld [smem:[#allocation5 + %s1013_s8]] }
  0x24   : > { %s920_s11 = smov [#allocation2]   ;;  %s159_s13 = sadd.s32 1, %s1013_s8 }
  0x25   : > { %s1020_s12 = sshll.u32 %s920_s11, 4  ;;  %s1024_s14 = sld [smem:[#allocation5 + %s159_s13]] }
  0x26   : > { %1215 = sst [smem:[#allocation34_spill]] %s1020_s12  ;;  %s921_s15 = smov [#allocation2 + $0x1]  }
  0x27   : > { %s1026_s21 = sshll.u32 %s921_s15, 4  ;;  %s176_s30 = sadd.s32 2, %s1013_s8 }
  0x28   : > { %1216 = sst [smem:[#allocation35_spill]] %s1026_s21 }
  0x29   : > { %s146_s22 = sshrl.u32 %s145_s10, 3  ;;  %s147_s24 = sand.u32 7, %s145_s10  }
  0x2a   : > { %s483_s26 = sshll.u32 %s146_s22, 4  ;;  %s1033_s11 = sld [smem:[#allocation5 + %s176_s30]] }
  0x2b   : > { %s149_s29 = sadd.s32 %s483_s26, %s147_s24  ;;  %s161_s13 = sshrl.u32 %s1024_s14, 3 }
  0x2c   : > { %s150_s6 = scalar_lea.hbm %s1196_s1, %s149_s29  ;;  %s1039_s10 = scalar_lea.hbm %s1196_s1, 128 }
  0x2d   : > { %s151_s7 = sshll.u32 %s150_s6, 4  ;;  %s152_s7 = int_to_ptr.hbm [resolvable:$true] %s151_s7 }
  0x2e   : > { %s624_s12 = sshra.s32 %s152_s7, 4  ;;  %s625_s12 = int_to_ptr.hbm [resolvable:$true] %s624_s12 }
  0x2f   : > { %s626_s15 = scalar_lea.hbm %s625_s12, 2  ;;  %p629_p1 = scmp.lt.s32.totalorder %s625_s12, %s1196_s1 }
  0x30   : > { %p627_p0 = scmp.ne.s32.totalorder %s625_s12, %s626_s15  ;;  %p630_p2 = scmp.lt.s32.totalorder %s1039_s10, %s626_s15 }
  0x32   : > { %p631_p3 = por %p630_p2, %p629_p1 }
  0x34   : > { %p632_p5 = pnand %p631_p3, %p627_p0 }
  0x36   : > { %635 = shalt.err (!%p632_p5)  }
  0x37   : > { %s922_s26 = smov 128   ;;  %s1217_s29 = sld [smem:[#allocation34_spill]] }
  0x38   : > { %s923_s30 = smov 1   ;;  %s162_s23 = sand.u32 7, %s1024_s14  }
  0x39   : > { %s484_s4 = sshll.u32 %s161_s13, 4  ;;  %s924_s12 = smov [#allocation2 + $0x2]  }
  0x3a   : > { %s164_s5 = sadd.s32 %s484_s4, %s162_s23  ;;  %s1051_s6 = sshll.u32 %s924_s12, 4  ;;  %s188_s6 = int_to_ptr.vmem [resolvable:$true] %s1051_s6 }
  0x3b   : > { %s165_s24 = scalar_lea.hbm %s1196_s1, %s164_s5  ;;  %s178_s21 = sshrl.u32 %s1033_s11, 3 }
  0x3c   : > { %s168_s20 = sshll.u32 %s165_s24, 4  ;;  %s179_s28 = sand.u32 7, %s1033_s11   ;;  %s169_s20 = int_to_ptr.hbm [resolvable:$true] %s168_s20 }
  0x3d   : > { %s1218_s2 = int_to_ptr.vmem [resolvable:$true] %s1217_s29  ;;  %s485_s18 = sshll.u32 %s178_s21, 4 }
  0x3e   : > { %158 = dma.hbm_to_vmem [thread:$0]  %s152_s7, 32, %s1218_s2, [#allocation3], %s922_s26, %s922_s26, %s923_s30 }
  0x3f   : > { %s648_s27 = sshra.s32 %s169_s20, 4  ;;  %s649_s27 = int_to_ptr.hbm [resolvable:$true] %s648_s27 }
  0x40   : > { %s650_s29 = scalar_lea.hbm %s649_s27, 2  ;;  %p653_p7 = scmp.lt.s32.totalorder %s649_s27, %s1196_s1 }
  0x41   : > { %p651_p6 = scmp.ne.s32.totalorder %s649_s27, %s650_s29  ;;  %p654_p9 = scmp.lt.s32.totalorder %s1039_s10, %s650_s29 }
  0x43   : > { %p655_p10 = por %p654_p9, %p653_p7 }
  0x45   : > { %p656_p11 = pnand %p655_p10, %p651_p6 }
  0x47   : > { %659 = shalt.err (!%p656_p11)  }
  0x48   : > { %s1219_s13 = sld [smem:[#allocation35_spill]]  ;;  %s181_s21 = sadd.s32 %s485_s18, %s179_s28 }
  0x49   : > { %s182_s4 = scalar_lea.hbm %s1196_s1, %s181_s21  ;;  %s193_s27 = sadd.s32 3, %s1013_s8 }
  0x4a   : > { %s185_s5 = sshll.u32 %s182_s4, 4  ;;  %s194_s12 = sld [smem:[#allocation5 + %s193_s27]]  ;;  %s186_s5 = int_to_ptr.hbm [resolvable:$true] %s185_s5 }
  0x4b   : > { %s672_s15 = sshra.s32 %s186_s5, 4  ;;  %s673_s15 = int_to_ptr.hbm [resolvable:$true] %s672_s15 }
  0x4c   : > { %s674_s22 = scalar_lea.hbm %s673_s15, 2  ;;  %p677_p13 = scmp.lt.s32.totalorder %s673_s15, %s1196_s1 }
  0x4d   : > { %p675_p12 = scmp.ne.s32.totalorder %s673_s15, %s674_s22  ;;  %p678_p0 = scmp.lt.s32.totalorder %s1039_s10, %s674_s22 }
  0x4e   : > { %s1220_s2 = int_to_ptr.vmem [resolvable:$true] %s1219_s13 }
  0x4f   : > { %175 = dma.hbm_to_vmem [thread:$0]  %s169_s20, 32, %s1220_s2, [#allocation3 + $0x1], %s922_s26, %s922_s26, %s923_s30 }
  0x50   : > { %p679_p1 = por %p678_p0, %p677_p13 }
  0x52   : > { %p680_p2 = pnand %p679_p1, %p675_p12 }
  0x54   : > { %683 = shalt.err (!%p680_p2)  }
  0x55   : > { %192 = dma.hbm_to_vmem [thread:$0]  %s186_s5, 32, %s188_s6, [#allocation3 + $0x2], %s922_s26, %s922_s26, %s923_s30 }
  0x56   : > { %s925_s18 = smov [#allocation2 + $0x3]   ;;  %s210_s28 = sadd.s32 4, %s1013_s8 }
  0x57   : > { %s1079_s20 = sshll.u32 %s925_s18, 4  ;;  %s211_s7 = sld [smem:[#allocation5 + %s210_s28]]  ;;  %s205_s20 = int_to_ptr.vmem [resolvable:$true] %s1079_s20 }
  0x58   : > { %s227_s14 = sadd.s32 5, %s1013_s8  ;;  %s195_s13 = sshrl.u32 %s194_s12, 3 }
  0x59   : > { %s196_s2 = sand.u32 7, %s194_s12   ;;  %s486_s21 = sshll.u32 %s195_s13, 4 }
  0x5a   : > { %s926_s11 = smov [#allocation2 + $0x4]   ;;  %s198_s4 = sadd.s32 %s486_s21, %s196_s2 }
  0x5b   : > { %s1084_s23 = sshll.u32 %s926_s11, 4  ;;  %s199_s5 = scalar_lea.hbm %s1196_s1, %s198_s4  ;;  %s222_s23 = int_to_ptr.vmem [resolvable:$true] %s1084_s23 }
  0x5c   : > { %s1090_s15 = sld [smem:[#allocation5 + %s227_s14]]  ;;  %s202_s22 = sshll.u32 %s199_s5, 4  ;;  %s203_s22 = int_to_ptr.hbm [resolvable:$true] %s202_s22 }
  0x5d   : > { %s212_s24 = sshrl.u32 %s211_s7, 3  ;;  %s213_s29 = sand.u32 7, %s211_s7  }
  0x5e   : > { %s696_s18 = sshra.s32 %s203_s22, 4  ;;  %s697_s18 = int_to_ptr.hbm [resolvable:$true] %s696_s18 }
  0x5f   : > { %s698_s12 = scalar_lea.hbm %s697_s18, 2  ;;  %p701_p5 = scmp.lt.s32.totalorder %s697_s18, %s1196_s1 }
  0x60   : > { %p699_p3 = scmp.ne.s32.totalorder %s697_s18, %s698_s12  ;;  %p702_p6 = scmp.lt.s32.totalorder %s1039_s10, %s698_s12 }
  0x62   : > { %p703_p7 = por %p702_p6, %p701_p5 }
  0x64   : > { %p704_p9 = pnand %p703_p7, %p699_p3 }
  0x66   : > { %707 = shalt.err (!%p704_p9)  }
  0x67   : > { %209 = dma.hbm_to_vmem [thread:$0]  %s203_s22, 32, %s205_s20, [#allocation3 + $0x3], %s922_s26, %s922_s26, %s923_s30 }
  0x68   : > { %s487_s7 = sshll.u32 %s212_s24, 4  ;;  %s927_s2 = smov [#allocation2 + $0x5]  }
  0x69   : > { %s215_s14 = sadd.s32 %s487_s7, %s213_s29  ;;  %s1099_s21 = sshll.u32 %s927_s2, 4  ;;  %s239_s21 = int_to_ptr.vmem [resolvable:$true] %s1099_s21 }
  0x6a   : > { %s216_s27 = scalar_lea.hbm %s1196_s1, %s215_s14  ;;  %s229_s6 = sshrl.u32 %s1090_s15, 3 }
  0x6b   : > { %s219_s5 = sshll.u32 %s216_s27, 4  ;;  %s230_s18 = sand.u32 7, %s1090_s15   ;;  %s220_s5 = int_to_ptr.hbm [resolvable:$true] %s219_s5 }
  0x6c   : > { %s488_s12 = sshll.u32 %s229_s6, 4  ;;  %s720_s28 = sshra.s32 %s220_s5, 4  ;;  %s721_s28 = int_to_ptr.hbm [resolvable:$true] %s720_s28 }
  0x6d   : > { %s722_s13 = scalar_lea.hbm %s721_s28, 2  ;;  %p725_p11 = scmp.lt.s32.totalorder %s721_s28, %s1196_s1 }
  0x6e   : > { %p723_p10 = scmp.ne.s32.totalorder %s721_s28, %s722_s13  ;;  %p726_p12 = scmp.lt.s32.totalorder %s1039_s10, %s722_s13 }
  0x70   : > { %p727_p13 = por %p726_p12, %p725_p11 }
  0x72   : > { %p728_p0 = pnand %p727_p13, %p723_p10 }
  0x74   : > { %731 = shalt.err (!%p728_p0)  }
  0x75   : > { %226 = dma.hbm_to_vmem [thread:$0]  %s220_s5, 32, %s222_s23, [#allocation3 + $0x4], %s922_s26, %s922_s26, %s923_s30 }
  0x76   : > { %s232_s15 = sadd.s32 %s488_s12, %s230_s18  ;;  %s244_s14 = sadd.s32 6, %s1013_s8 }
  0x77   : > { %s233_s7 = scalar_lea.hbm %s1196_s1, %s232_s15  ;;  %s245_s11 = sld [smem:[#allocation5 + %s244_s14]] }
  0x78   : > { %s236_s2 = sshll.u32 %s233_s7, 4  ;;  %s237_s2 = int_to_ptr.hbm [resolvable:$true] %s236_s2 }
  0x79   : > { %s744_s4 = sshra.s32 %s237_s2, 4  ;;  %s745_s4 = int_to_ptr.hbm [resolvable:$true] %s744_s4 }
  0x7a   : > { %s746_s27 = scalar_lea.hbm %s745_s4, 2  ;;  %p749_p2 = scmp.lt.s32.totalorder %s745_s4, %s1196_s1 }
  0x7b   : > { %p747_p1 = scmp.ne.s32.totalorder %s745_s4, %s746_s27  ;;  %p750_p3 = scmp.lt.s32.totalorder %s1039_s10, %s746_s27 }
  0x7d   : > { %p751_p5 = por %p750_p3, %p749_p2 }
  0x7f   : > { %p752_p6 = pnand %p751_p5, %p747_p1 }
  0x81   : > { %755 = shalt.err (!%p752_p6)  }
  0x82   : > { %243 = dma.hbm_to_vmem [thread:$0]  %s237_s2, 32, %s239_s21, [#allocation3 + $0x5], %s922_s26, %s922_s26, %s923_s30 }
  0x83   : > { %s261_s23 = sadd.s32 7, %s1013_s8  ;;  %s928_s18 = smov [#allocation2 + $0x6]  }
  0x84   : > { %s262_s5 = sld [smem:[#allocation5 + %s261_s23]]  ;;  %s255_s12 = sshll.u32 %s928_s18, 4  ;;  %s256_s12 = int_to_ptr.vmem [resolvable:$true] %s255_s12 }
  0x85   : > { %s246_s13 = sshrl.u32 %s245_s11, 3  ;;  %s247_s20 = sand.u32 7, %s245_s11  }
  0x86   : > { %s489_s22 = sshll.u32 %s246_s13, 4  ;;  %s929_s14 = smov [#allocation2 + $0x7]  }
  0x87   : > { %s249_s15 = sadd.s32 %s489_s22, %s247_s20  ;;  %s1131_s4 = sshll.u32 %s929_s14, 4  ;;  %s273_s4 = int_to_ptr.vmem [resolvable:$true] %s1131_s4 }
  0x88   : > { %s250_s7 = scalar_lea.hbm %s1196_s1, %s249_s15 }
  0x89   : > { %s253_s27 = sshll.u32 %s250_s7, 4  ;;  %s254_s27 = int_to_ptr.hbm [resolvable:$true] %s253_s27 }
  0x8a   : > { %s263_s6 = sshrl.u32 %s262_s5, 3  ;;  %s264_s8 = sand.u32 7, %s262_s5  }
  0x8b   : > { %s768_s21 = sshra.s32 %s254_s27, 4  ;;  %s769_s21 = int_to_ptr.hbm [resolvable:$true] %s768_s21 }
  0x8c   : > { %s770_s2 = scalar_lea.hbm %s769_s21, 2  ;;  %p773_p9 = scmp.lt.s32.totalorder %s769_s21, %s1196_s1 }
  0x8d   : > { %p771_p7 = scmp.ne.s32.totalorder %s769_s21, %s770_s2  ;;  %p774_p10 = scmp.lt.s32.totalorder %s1039_s10, %s770_s2 }
  0x8f   : > { %p775_p11 = por %p774_p10, %p773_p9 }
  0x91   : > { %p776_p12 = pnand %p775_p11, %p771_p7 }
  0x93   : > { %779 = shalt.err (!%p776_p12)  }
  0x94   : > { %260 = dma.hbm_to_vmem [thread:$0]  %s254_s27, 32, %s256_s12, [#allocation3 + $0x6], %s922_s26, %s922_s26, %s923_s30 }
  0x95   : > { %s490_s23 = sshll.u32 %s263_s6, 4 }
  0x96   : > { %s266_s5 = sadd.s32 %s490_s23, %s264_s8 }
  0x97   : > { %s267_s20 = scalar_lea.hbm %s1196_s1, %s266_s5 }
  0x98   : > { %s270_s22 = sshll.u32 %s267_s20, 4  ;;  %s271_s22 = int_to_ptr.hbm [resolvable:$true] %s270_s22 }
  0x99   : > { %s792_s15 = sshra.s32 %s271_s22, 4  ;;  %s793_s15 = int_to_ptr.hbm [resolvable:$true] %s792_s15 }
  0x9a   : > { %s794_s24 = scalar_lea.hbm %s793_s15, 2  ;;  %p797_p0 = scmp.lt.s32.totalorder %s793_s15, %s1196_s1 }
  0x9b   : > { %p795_p13 = scmp.ne.s32.totalorder %s793_s15, %s794_s24  ;;  %p798_p1 = scmp.lt.s32.totalorder %s1039_s10, %s794_s24 }
  0x9d   : > { %p799_p2 = por %p798_p1, %p797_p0 }
  0x9f   : > { %p800_p3 = pnand %p799_p2, %p795_p13 }
  0xa1   : > { %803 = shalt.err (!%p800_p3)  }
  0xa2   : > { %277 = dma.hbm_to_vmem [thread:$0]  %s271_s22, 32, %s273_s4, [#allocation3 + $0x7], %s922_s26, %s922_s26, %s923_s30 }
  0xa3   : > { %s1152_s12 = scalar_lea.vmem [#allocation9], %s1017_s9 }
  0xa4   : > { %874 = dma.done.wait [#allocation3], 32 }
  0xa5   : > { %875 = vsyncadd [#allocation3], 4294967264 }
  0xa6   : > { %876 = dma.done.wait [#allocation3 + $0x1], 32 }
  0xa7   : > { %877 = vsyncadd [#allocation3 + $0x1], 4294967264 }
  0xa8   : > { %878 = dma.done.wait [#allocation3 + $0x2], 32 }
  0xa9   : > { %879 = vsyncadd [#allocation3 + $0x2], 4294967264 }
  0xaa   : > { %880 = dma.done.wait [#allocation3 + $0x3], 32 }
  0xab   : > { %881 = vsyncadd [#allocation3 + $0x3], 4294967264 }
  0xac   : > { %882 = dma.done.wait [#allocation3 + $0x4], 32 }
  0xad   : > { %883 = vsyncadd [#allocation3 + $0x4], 4294967264 }
  0xae   : > { %884 = dma.done.wait [#allocation3 + $0x5], 32 }
  0xaf   : > { %885 = vsyncadd [#allocation3 + $0x5], 4294967264 }
  0xb0   : > { %886 = dma.done.wait [#allocation3 + $0x6], 32 }
  0xb1   : > { %887 = vsyncadd [#allocation3 + $0x6], 4294967264 }
  0xb2   : > { %888 = dma.done.wait [#allocation3 + $0x7], 32 }
  0xb3   : > { %889 = vsyncadd [#allocation3 + $0x7], 4294967264  ;;  %s504_s9 = sshll.u32 %s908_s19, 4  ;;  %v295_v0 = vld [vmem:[#allocation2] sm:$0xff]  ;;  %v299_v1 = vld [vmem:[#allocation6] sm:$0xff]  ;;  %s321_s14 = sshll.u32 %s1152_s12, 4  ;;  %s322_s14 = int_to_ptr.vmem [resolvable:$true] %s321_s14 }
  0xb4   : > { %s319_s30 = scalar_lea.hbm %s1198_s3, %s504_s9  ;;  %v296_v2 = vld [vmem:[#allocation2 + $0x8] sm:$0xff]  ;;  %v297_v3 = vmul.f32 16.0, %v295_v0  ;;  %v300_v5 = vld [vmem:[#allocation6 + $0x8] sm:$0xff]  ;;  %s1221_s19 = sand.u32 1, %s900_s17  }
  0xb5   : > { %v298_v4 = vmul.f32 16.0, %v296_v2  ;;  %s323_s4 = sshll.u32 %s319_s30, 4  ;;  %s306_s27 = scalar_lea.sflag [#allocation8], %s1221_s19  ;;  %s324_s4 = int_to_ptr.hbm [resolvable:$true] %s323_s4 }
  0xb6   : > { %v301_v6 = vadd.f32 %v299_v1, %v297_v3  ;;  %s830_s6 = sshra.s32 %s324_s4, 4  ;;  %s836_s11 = scalar_lea.hbm %s1198_s3, 32  ;;  %s831_s6 = int_to_ptr.hbm [resolvable:$true] %s830_s6 }
  0xb7   : > { %v302_v7 = vadd.f32 %v300_v5, %v298_v4  ;;  %s832_s8 = scalar_lea.hbm %s831_s6, 16  ;;  %p837_p9 = scmp.lt.s32.totalorder %s831_s6, %s1198_s3 }
  0xb8   : > { %303 = vst [vmem:[%s1152_s12] sm:$0xff] %v301_v6  ;;  %p833_p5 = scmp.ne.s32.totalorder %s831_s6, %s832_s8  ;;  %p838_p10 = scmp.lt.s32.totalorder %s836_s11, %s832_s8 }
  0xb9   : > { %304 = vst [vmem:[%s1152_s12 + $0x8] sm:$0xff] %v302_v7 }
  0xba   : > { %p834_p6 = pnand %p833_p5, %p993_p4  ;;  %p839_p11 = por %p838_p10, %p837_p9 }
  0xbc   : > { %p835_p7 = pneg %p834_p6 }
  0xbe   : > { %p840_p12 = pnand %p839_p11, %p835_p7 }
  0xc0   : > { %843 = shalt.err (!%p840_p12)
}
  0xc1   : > { %509 = dma.vmem_to_hbm [thread:$0]  (%p993_p4), %s322_s14, 256, %s324_s4, %s306_s27  }
  0xc2 PF: > { %p521_p13 = scmp.ge.s32.totalorder %s916_s0, 2  ;;  %s335_s18 = sand.u32 1, %s896_s16  }
  0xc3   : > { %s336_s13 = scalar_lea.sflag [#allocation8], %s335_s18 }
  0xc4   : > { %p516_p0 = pnand %p521_p13, %p1000_p8 }
  0xc6   : > { %p517_p1 = pneg %p516_p0 }
  0xc8   : > { %891 = dma.done.wait (%p517_p1), %s336_s13, 256  }
  0xc9   : > { %893 = vsyncadd (%p517_p1), %s336_s13, 4294967040  ;;  %s25_s0 = sadd.s32 1, %s916_s0   ;;  %s1223_s20 = sld [smem:[#allocation29_spill]] }
  0xca   : > { %p22_p2 = scmp.ge.s32.totalorder %s25_s0, 4   ;;  %s1224_s18 = sld [smem:[#allocation33_spill]] }
  0xcb   : > { %s1225_s19 = sld [smem:[#allocation30_spill]]  ;;  %s1227_s16 = smov %s900_s17 }
  0xcc   : > { %s1226_s25 = sld [smem:[#allocation31_spill]] }
  0xce   :  { %24 = sbr.rel (!%p22_p2) target bundleno = 11 (0xb), region = 91 }
  0xcf   : > { %s1228_s17 = smov %s1223_s20 }
  0xd2   : > { %s1229_s20 = smov %s1226_s25 }
  0xd3   :  { %342 = vsyncpa [#allocation7], 1 }
  0xd4   :  { %344 = vsyncpa [#allocation7 + $0x1], 1 }
  0xd5   :  { %345 = vsyncpa [#allocation8], 1 }
  0xd6   :  { %347 = vsyncpa [#allocation8 + $0x1], 1 }
  0xd7   :  { %348 = vsyncmov [#allocation3] }
  0xda   :  { %s349_s22 = vpop.sfrf %348 }
  0xdb   :  { %p496_p4 = scmp.ne.s32.totalorder %s349_s22, 0 }
  0xdd   :  { %353 = shalt.err (%p496_p4)  }
  0xde   :  { %355 = vsyncmov [#allocation3 + $0x1] }
  0xe1   :  { %s356_s15 = vpop.sfrf %355 }
  0xe2   :  { %p497_p8 = scmp.ne.s32.totalorder %s356_s15, 0 }
  0xe4   :  { %360 = shalt.err (%p497_p8)  }
  0xe5   :  { %362 = vsyncmov [#allocation3 + $0x2] }
  0xe8   :  { %s363_s24 = vpop.sfrf %362 }
  0xe9   :  { %p498_p3 = scmp.ne.s32.totalorder %s363_s24, 0 }
  0xeb   :  { %367 = shalt.err (%p498_p3)  }
  0xec   :  { %369 = vsyncmov [#allocation3 + $0x3] }
  0xef   :  { %s370_s29 = vpop.sfrf %369 }
  0xf0   :  { %p499_p5 = scmp.ne.s32.totalorder %s370_s29, 0 }
  0xf2   :  { %374 = shalt.err (%p499_p5)  }
  0xf3   :  { %376 = vsyncmov [#allocation3 + $0x4] }
  0xf6   :  { %s377_s1 = vpop.sfrf %376 }
  0xf7   :  { %p500_p6 = scmp.ne.s32.totalorder %s377_s1, 0 }
  0xf9   :  { %381 = shalt.err (%p500_p6)  }
  0xfa   :  { %383 = vsyncmov [#allocation3 + $0x5] }
  0xfd   :  { %s384_s3 = vpop.sfrf %383 }
  0xfe   :  { %p501_p7 = scmp.ne.s32.totalorder %s384_s3, 0 }
 0x100   :  { %388 = shalt.err (%p501_p7)  }
 0x101   :  { %390 = vsyncmov [#allocation3 + $0x6] }
 0x104   :  { %s391_s16 = vpop.sfrf %390 }
 0x105   :  { %p502_p9 = scmp.ne.s32.totalorder %s391_s16, 0 }
 0x107   :  { %395 = shalt.err (%p502_p9)  }
 0x108   :  { %397 = vsyncmov [#allocation3 + $0x7] }
 0x10b   :  { %s398_s17 = vpop.sfrf %397 }
 0x10c   :  { %p503_p10 = scmp.ne.s32.totalorder %s398_s17, 0 }
 0x10e   :  { %402 = shalt.err (%p503_p10)  }

</bundles_post_ra>
